<compile_context>
chip_gen: v5e
topology: v5e:2x2
jax: 0.10.0
libtpu: 0.0.40
codegen_flags: <defaults>
</compile_context>

<pallas_src>
from types import SimpleNamespace

import numpy as np
import jax
import jax.numpy as jnp
from jax.experimental import pallas as pl
from jax.experimental.pallas import tpu as pltpu


# --------------------------------------------------------------------------------------
# Kernels
# --------------------------------------------------------------------------------------
def _make_cls_kernel(G, ncrops):
    """CLS cross-entropy partial sum for one batch tile (all crops, looped in-kernel)."""

    def kernel(params_ref, s_cls_ref, t_cls_ref, center_ref, l1_ref, L_ref, T_ref, S_ref):
        f32 = jnp.float32
        inv_st = params_ref[0]          # 1 / student_temp
        inv_tt = params_ref[1]          # 1 / teacher_temp
        scale1 = params_ref[2]          # lambda1 / (n_loss_terms1 * B)
        center = center_ref[...].astype(f32)                                  # (1, D)

        L_ref[...] = jnp.zeros_like(L_ref)      # sum_v log_softmax(student_v)   (TB, D)
        T_ref[...] = jnp.zeros_like(T_ref)      # sum_q softmax(teacher_q)       (TB, D)
        S_ref[...] = jnp.zeros_like(S_ref)      # sum_q <p_q, logp_q>            (1, 1)

        def log_softmax(x):
            sh = x - jnp.max(x, axis=-1, keepdims=True)
            return sh - jnp.log(jnp.sum(jnp.exp(sh), axis=-1, keepdims=True))

        # Global crops: teacher softmax + student log-softmax (each computed ONCE).
        @pl.loop(0, G)
        def _(q):
            t = (t_cls_ref[q].astype(f32) - center) * inv_tt                  # (TB, D)
            e = jnp.exp(t - jnp.max(t, axis=-1, keepdims=True))
            p = e / jnp.sum(e, axis=-1, keepdims=True)                        # exact recip
            logp = log_softmax(s_cls_ref[q].astype(f32) * inv_st)
            T_ref[...] = T_ref[...] + p
            L_ref[...] = L_ref[...] + logp
            S_ref[...] = S_ref[...] + jnp.sum(p * logp, keepdims=True)        # q == v term

        # Local crops: only the student log-softmax contributes to L.
        @pl.loop(G, ncrops)
        def _(v):
            L_ref[...] = L_ref[...] + log_softmax(s_cls_ref[v].astype(f32) * inv_st)

        # sum_q sum_{v != q} sum_D(-p_q * logp_v) = -<T, L> + S
        acc1 = S_ref[...] - jnp.sum(T_ref[...] * L_ref[...], keepdims=True)   # (1, 1)
        l1 = acc1 * scale1
        # Lane-dense partial store (full-vreg vst); wrapper reads [i, 0, 0].
        l1_ref[...] = jnp.broadcast_to(l1.reshape(1, 1, 1), l1_ref.shape)

    return kernel


def _patch_kernel(params_ref, s_patch_ref, t_patch_ref, mw_ref, center2_ref, l2_ref):
    """Patch cross-entropy partial sum for one (batch tile, global crop, token tile)."""
    f32 = jnp.float32
    inv_st = params_ref[0]
    inv_tt = params_ref[1]
    scale2 = params_ref[3]              # lambda2 / (n_loss_terms2 * B)
    center2 = center2_ref[...].astype(f32)                                    # (1, Dp)

    # Teacher patch softmax (exact reciprocal).
    tp = (t_patch_ref[...].astype(f32) - center2) * inv_tt                    # (TB, TN, Dp)
    tp_e = jnp.exp(tp - jnp.max(tp, axis=-1, keepdims=True))
    tp_probs = tp_e / jnp.sum(tp_e, axis=-1, keepdims=True)

    # Student patch log-softmax.
    sp = s_patch_ref[...].astype(f32) * inv_st
    sp_sh = sp - jnp.max(sp, axis=-1, keepdims=True)
    sp_logp = sp_sh - jnp.log(jnp.sum(jnp.exp(sp_sh), axis=-1, keepdims=True))

    loss2 = jnp.sum(-tp_probs * sp_logp, axis=-1, keepdims=True)              # (TB, TN, 1)
    # mw is zero at masked positions and already normalised per batch row, so the
    # redundant extra `* mask` from the reference is dropped.
    part = jnp.sum(loss2 * mw_ref[...], axis=(0, 1), keepdims=True)           # (1, 1, 1)
    l2 = part * scale2
    l2_ref[...] = jnp.broadcast_to(l2.reshape(1, 1, 1), l2_ref.shape)


# --------------------------------------------------------------------------------------
# Tiling / VMEM planning (generation-aware)
# --------------------------------------------------------------------------------------
def _vmem_plan():
    """(per-step input-bytes budget, vmem_limit_bytes) based on the chip's VMEM."""
    cap = 128 * 1024 * 1024
    try:
        cap = int(getattr(pltpu.get_tpu_info(), "vmem_capacity_bytes", cap))
    except Exception:  # pragma: no cover - conservative fallback
        pass
    if cap <= 64 * 1024 * 1024:                       # v7x-class: 64 MiB physical VMEM
        return 6 * 1024 * 1024, 52 * 1024 * 1024
    return 28 * 1024 * 1024, 100 * 1024 * 1024        # v5e / v6e: 128 MiB VMEM


def _divisors(n, sublane_or_full):
    """Divisors of n; if sublane_or_full, only multiples of 8 or n itself."""
    return [d for d in range(1, n + 1)
            if n % d == 0 and (not sublane_or_full or d % 8 == 0 or d == n)]


def _pick_batch_tile(B, bytes_per_row, budget):
    """Largest sublane-valid batch tile within budget.

    Never silently falls back to the full batch: if nothing fits, the SMALLEST valid
    tile is returned.  Capped at B//2 when B >= 16 so the grid has >= 2 steps (v7x
    megacore); neutral on v5e/v6e.
    """
    cand = _divisors(B, True)                         # tile sits in the sublane slot
    cap = B // 2 if B >= 16 else B
    capped = [d for d in cand if d <= cap] or cand
    fitting = [d for d in capped if d * bytes_per_row <= budget]
    return max(fitting) if fitting else min(capped)


def _pick_patch_tiles(B, N, per_bn_bytes, budget):
    """(batch_tile, token_tile) for the patch kernel.

    The token axis occupies the sublane slot of the 4-D blocks, so it must be a
    multiple of 8 or the full N; the batch tile is a higher dim (unconstrained).
    """
    tb_cand = _divisors(B, False)
    tn_cand = _divisors(N, True)
    cap = B // 2 if B >= 16 else B
    tb_cand = [d for d in tb_cand if d <= cap] or [min(tb_cand)]
    best = None
    for tn in tn_cand:
        for tb in tb_cand:
            if tb * tn * per_bn_bytes <= budget:
                score = (tb * tn, tn)                 # prefer bigger tiles, then longer tokens
                if best is None or score > best[0]:
                    best = (score, (tb, tn))
    if best is None:
        return min(tb_cand), min(tn_cand)             # smallest valid tiles, never the full slab
    return best[1]


# --------------------------------------------------------------------------------------
# pallas_call wrappers
# --------------------------------------------------------------------------------------
def _cls_loss_pallas(params, student_cls, teacher_cls, center, G, ncrops, tb, vmem_limit):
    _, B, D = student_cls.shape
    nb = B // tb
    smem = pl.BlockSpec(memory_space=pltpu.MemorySpace.SMEM)
    out = pl.pallas_call(
        _make_cls_kernel(G, ncrops),
        grid=(nb,),
        in_specs=[
            smem,                                                       # params (4,)
            pl.BlockSpec((ncrops, tb, D), lambda i: (0, i, 0)),         # student cls
            pl.BlockSpec((G, tb, D), lambda i: (0, i, 0)),              # teacher cls
            pl.BlockSpec((1, D), lambda i: (0, 0)),                     # center
        ],
        out_specs=pl.BlockSpec((1, 8, 128), lambda i: (i, 0, 0)),
        out_shape=jax.ShapeDtypeStruct((nb, 8, 128), jnp.float32),
        scratch_shapes=[pltpu.VMEM((tb, D), jnp.float32),               # L accumulator
                        pltpu.VMEM((tb, D), jnp.float32),               # T accumulator
                        pltpu.VMEM((1, 1), jnp.float32)],               # S accumulator
        compiler_params=pltpu.CompilerParams(
            dimension_semantics=("parallel",),
            vmem_limit_bytes=vmem_limit),
    )(params, student_cls, teacher_cls, center)
    return jnp.sum(out[:, 0, 0])


def _patch_loss_pallas(params, student_patch, teacher_patch, mask_weight, center2,
                       tb, tn, vmem_limit):
    G, B, N, Dp = student_patch.shape
    nb, nn = B // tb, N // tn
    smem = pl.BlockSpec(memory_space=pltpu.MemorySpace.SMEM)
    n_out = nb * G * nn
    # TODO(synk): if profiling on v5e shows exposed DMA, add pipeline_mode=pl.Buffered(3)
    # to the two patch-tensor BlockSpecs (128 MiB VMEM has the headroom; avoid on v7x).
    out = pl.pallas_call(
        _patch_kernel,
        grid=(nb, G, nn),
        in_specs=[
            smem,                                                              # params (4,)
            pl.BlockSpec((None, tb, tn, Dp), lambda i, q, n: (q, i, n, 0)),    # student patch
            pl.BlockSpec((None, tb, tn, Dp), lambda i, q, n: (q, i, n, 0)),    # teacher patch
            pl.BlockSpec((None, tb, tn, 1), lambda i, q, n: (q, i, n, 0)),     # mask weight
            pl.BlockSpec((1, Dp), lambda i, q, n: (0, 0)),                     # center2
        ],
        out_specs=pl.BlockSpec((1, 8, 128),
                               lambda i, q, n: (i * (G * nn) + q * nn + n, 0, 0)),
        out_shape=jax.ShapeDtypeStruct((n_out, 8, 128), jnp.float32),
        compiler_params=pltpu.CompilerParams(
            dimension_semantics=("parallel", "parallel", "parallel"),
            vmem_limit_bytes=vmem_limit),
    )(params, student_patch, teacher_patch, mask_weight, center2)
    return jnp.sum(out[:, 0, 0])


# --------------------------------------------------------------------------------------
# Module
# --------------------------------------------------------------------------------------
class DINOLoss:
    """JAX/Pallas port of the PyTorch DINOLoss module (forward pass)."""

    def __init__(self, out_dim, patch_out_dim, global_crops_number, local_crops_number, cfg):
        self.student_temp = cfg.student_temp
        self.center_momentum = cfg.center_momentum
        self.global_crops_number = global_crops_number
        self.local_crops_number = local_crops_number
        self.ncrops = global_crops_number + local_crops_number
        self.center = jnp.zeros((1, out_dim), jnp.float32)
        self.center2 = jnp.zeros((1, 1, patch_out_dim), jnp.float32)
        self.lambda1 = cfg.lambda1
        self.lambda2 = cfg.lambda2
        self.teacher_temp_schedule = np.concatenate((
            np.linspace(cfg.warmup_teacher_temp, cfg.teacher_temp, cfg.warmup_teacher_temp_epochs),
            np.ones(cfg.epochs - cfg.warmup_teacher_temp_epochs) * cfg.teacher_temp))

    def __call__(self, student_output_global, student_output_local, student_masks,
                 teacher_output, epoch, lambda2):
        student_global_cls, student_patch = student_output_global[0], student_output_global[1]
        student_local_cls = student_output_local[0]
        teacher_cls, teacher_patch = teacher_output[0], teacher_output[1]
        attn = teacher_output[-1]

        G, ncrops = self.global_crops_number, self.ncrops
        B = teacher_cls.shape[0] // G
        D = teacher_cls.shape[-1]
        N, Dp = teacher_patch.shape[-2], teacher_patch.shape[-1]
        H = attn.shape[1]
        temp = float(self.teacher_temp_schedule[epoch])

        # Native dtype on the wire (bf16 stays bf16); kernels up-cast to f32.
        student_cls_r = jnp.concatenate([student_global_cls, student_local_cls],
                                        axis=0).reshape(ncrops, B, D)
        teacher_cls_r = teacher_cls.reshape(G, B, D)
        student_patch_r = student_patch.reshape(G, B, N, Dp)
        teacher_patch_r = teacher_patch.reshape(G, B, N, Dp)

        # Attention-derived token weights.  The normalising sum spans the FULL token
        # axis, so it is computed here on the tiny (G,B,N)/(G,B,H,N) tensors — this is
        # what lets the Pallas patch kernel tile the token axis.  mask_weight is zero
        # at masked positions, so the kernel needs no separate mask multiply.
        attn_r = attn.reshape(G, B, H, N).astype(jnp.float32)
        mask_r = jnp.asarray(student_masks).reshape(G, B, N)
        awm = jnp.where(mask_r, jnp.mean(attn_r, axis=2), 0.0)
        awm_sum = jnp.sum(awm, axis=-1, keepdims=True)
        mask_weight = (awm / jnp.maximum(awm_sum, 1e-9))[..., None]    # (G, B, N, 1) f32

        center = self.center.astype(jnp.float32)                       # (1, D)
        center2 = self.center2.reshape(1, Dp).astype(jnp.float32)      # (1, Dp)

        n1 = G * (ncrops - 1)
        n2 = G
        params = jnp.array(
            [1.0 / self.student_temp,
             1.0 / temp,
             (self.lambda1 / (n1 * B)) if n1 else 0.0,
             (float(lambda2) / (n2 * B)) if n2 else 0.0],
            dtype=jnp.float32)

        budget, vmem_limit = _vmem_plan()

        if n1:
            cls_row_bytes = D * (ncrops * student_cls_r.dtype.itemsize
                                 + G * teacher_cls_r.dtype.itemsize)
            tb_cls = _pick_batch_tile(B, cls_row_bytes, budget)
            l1 = _cls_loss_pallas(params, student_cls_r, teacher_cls_r, center,
                                  G, ncrops, tb_cls, vmem_limit)
        else:
            l1 = jnp.float32(0.0)

        if n2:
            per_bn_bytes = Dp * (student_patch_r.dtype.itemsize
                                 + teacher_patch_r.dtype.itemsize) + 4
            tb_p, tn_p = _pick_patch_tiles(B, N, per_bn_bytes, budget)
            l2 = _patch_loss_pallas(params, student_patch_r, teacher_patch_r,
                                    mask_weight, center2, tb_p, tn_p, vmem_limit)
        else:
            l2 = jnp.float32(0.0)

        self._update_center(teacher_cls, teacher_patch)
        return l1, l2, l1 + l2

    def _update_center(self, teacher_cls, teacher_patch):
        # TODO(synk): dist.all_reduce has no Pallas equivalent here; single-device (world_size = 1).
        m = self.center_momentum
        tc = teacher_cls.astype(jnp.float32)
        tp = teacher_patch.astype(jnp.float32)
        cls_center = jnp.sum(tc, axis=0, keepdims=True) / tc.shape[0]
        self.center = self.center * m + cls_center * (1.0 - m)
        patch_center = jnp.sum(jnp.mean(tp, axis=1), axis=0, keepdims=True) / tp.shape[0]
        self.center2 = self.center2 * m + patch_center[None] * (1.0 - m)


# ------------------------ pure-JAX reference (for verification) ------------------------
def reference_loss(student_global_cls, student_local_cls, student_patch, student_masks,
                   teacher_cls, teacher_patch, attn, center, center2,
                   student_temp, temp, lambda1, lambda2, G, ncrops):
    student_cls = jnp.concatenate([student_global_cls, student_local_cls], 0) / student_temp
    student_cls_c = jnp.split(student_cls, ncrops, axis=0)
    student_patch_c = jnp.split(student_patch / student_temp, G, axis=0)
    teacher_cls_c = jnp.split(jax.nn.softmax((teacher_cls - center) / temp, axis=-1), G, axis=0)
    teacher_patch_c = jnp.split(jax.nn.softmax((teacher_patch - center2) / temp, axis=-1), G, axis=0)
    attn_c = jnp.split(attn, G, axis=0)

    total1, total2, n1, n2 = 0.0, 0.0, 0, 0
    for q in range(G):
        for v in range(ncrops):
            if v == q:
                loss2 = jnp.sum(-teacher_patch_c[q]
                                * jax.nn.log_softmax(student_patch_c[v], axis=-1), axis=-1)
                mask = student_masks[v]
                awm = jnp.mean(attn_c[q], axis=1)
                awm = jnp.where(mask, awm, 0.0)
                awm_sum = jnp.sum(awm, axis=1)[:, None]
                mw = awm / jnp.maximum(awm_sum, 1e-9)
                loss2 = jnp.sum(loss2 * mask.astype(jnp.float32) * mw, axis=-1)
                total2 = total2 + jnp.mean(loss2)
                n2 += 1
            else:
                loss1 = jnp.sum(-teacher_cls_c[q]
                                * jax.nn.log_softmax(student_cls_c[v], axis=-1), axis=-1)
                total1 = total1 + jnp.mean(loss1)
                n1 += 1
    total1 = total1 / n1 * lambda1
    total2 = total2 / n2 * lambda2
    return total1, total2, total1 + total2


if __name__ == "__main__":
    cfg = SimpleNamespace(student_temp=0.1, center_momentum=0.9, lambda1=1.0, lambda2=1.0,
                          warmup_teacher_temp=0.04, teacher_temp=0.07,
                          warmup_teacher_temp_epochs=3, epochs=10)

    out_dim, patch_out_dim = 128, 64
    G, L = 2, 2                 # global / local crops
    ncrops = G + L
    B, N, H = 2, 16, 4          # batch per crop, num patches, num heads

    key = jax.random.PRNGKey(0)
    ks = jax.random.split(key, 7)
    student_global_cls = jax.random.normal(ks[0], (G * B, out_dim), jnp.float32)
    student_local_cls = jax.random.normal(ks[1], (L * B, out_dim), jnp.float32)
    student_patch = jax.random.normal(ks[2], (G * B, N, patch_out_dim), jnp.float32)
    teacher_cls = jax.random.normal(ks[3], (G * B, out_dim), jnp.float32)
    teacher_patch = jax.random.normal(ks[4], (G * B, N, patch_out_dim), jnp.float32)
    attn = jax.random.uniform(ks[5], (G * B, H, N), jnp.float32)
    student_masks = jax.random.bernoulli(ks[6], 0.6, (G, B, N))   # bool masks for global crops

    loss_mod = DINOLoss(out_dim, patch_out_dim, G, L, cfg)
    epoch, lambda2 = 1, 0.5

    l1, l2, lt = loss_mod((student_global_cls, student_patch),
                          (student_local_cls,),
                          student_masks,
                          (teacher_cls, teacher_patch, attn),
                          epoch, lambda2)
    jax.block_until_ready(lt)

    r1, r2, rt = reference_loss(student_global_cls, student_local_cls, student_patch,
                                student_masks, teacher_cls, teacher_patch, attn,
                                jnp.zeros((1, out_dim), jnp.float32),
                                jnp.zeros((1, 1, patch_out_dim), jnp.float32),
                                cfg.student_temp, float(loss_mod.teacher_temp_schedule[epoch]),
                                cfg.lambda1, lambda2, G, ncrops)

    assert np.allclose(np.asarray(l1), np.asarray(r1), rtol=2e-3, atol=1e-4), (l1, r1)
    assert np.allclose(np.asarray(l2), np.asarray(r2), rtol=2e-3, atol=1e-4), (l2, r2)
    assert np.allclose(np.asarray(lt), np.asarray(rt), rtol=2e-3, atol=1e-4), (lt, rt)
    print("KERNEL_OK")
</pallas_src>

<mosaic_0001>
module attributes {stable_mosaic.version = 11 : i64} {
  func.func @kernel(%arg0: i32, %arg1: memref<4xf32, #tpu.memory_space<smem>>, %arg2: memref<4x2x128xf32, #tpu.memory_space<vmem>>, %arg3: memref<2x2x128xf32, #tpu.memory_space<vmem>>, %arg4: memref<1x128xf32, #tpu.memory_space<vmem>>, %arg5: memref<1x8x128xf32, #tpu.memory_space<vmem>>, %arg6: memref<2x128xf32, #tpu.memory_space<vmem>>, %arg7: memref<2x128xf32, #tpu.memory_space<vmem>>, %arg8: memref<1x1xf32, #tpu.memory_space<vmem>>) attributes {dimension_semantics = [#tpu.dimension_semantics<parallel>], iteration_bounds = array<i64: 1>, scalar_prefetch = 0 : i64, scratch_operands = 3 : i64, tpu.core_type = #tpu.core_type<tc>, window_params = [{transform_indices = @transform_0, window_bounds = array<i64: 4>}, {transform_indices = @transform_1, window_bounds = array<i64: 4, 2, 128>}, {transform_indices = @transform_2, window_bounds = array<i64: 2, 2, 128>}, {pipeline_mode = #tpu.pipeline_mode<synchronous>, transform_indices = @transform_3, window_bounds = array<i64: 1, 128>}, {transform_indices = @transform_4, window_bounds = array<i64: 1, 8, 128>}]} {
    %c0 = arith.constant 0 : index
    %0 = memref.load %arg1[%c0] : memref<4xf32, #tpu.memory_space<smem>>
    %c1 = arith.constant 1 : index
    %1 = memref.load %arg1[%c1] : memref<4xf32, #tpu.memory_space<smem>>
    %c2 = arith.constant 2 : index
    %2 = memref.load %arg1[%c2] : memref<4xf32, #tpu.memory_space<smem>>
    %c0_0 = arith.constant 0 : index
    %c0_1 = arith.constant 0 : index
    %3 = vector.load %arg4[%c0_0, %c0_1] : memref<1x128xf32, #tpu.memory_space<vmem>>, vector<1x128xf32>
    %cst = arith.constant 0.000000e+00 : f32
    %4 = vector.broadcast %cst : f32 to vector<2x128xf32>
    %c0_2 = arith.constant 0 : index
    %c0_3 = arith.constant 0 : index
    %5 = vector.load %arg6[%c0_2, %c0_3] : memref<2x128xf32, #tpu.memory_space<vmem>>, vector<2x128xf32>
    tpu.vector_store %arg6[%c0_2, %c0_3], %4 {strides = array<i32>} : memref<2x128xf32, #tpu.memory_space<vmem>>, vector<2x128xf32>,
    %cst_4 = arith.constant 0.000000e+00 : f32
    %6 = vector.broadcast %cst_4 : f32 to vector<2x128xf32>
    %c0_5 = arith.constant 0 : index
    %c0_6 = arith.constant 0 : index
    %7 = vector.load %arg7[%c0_5, %c0_6] : memref<2x128xf32, #tpu.memory_space<vmem>>, vector<2x128xf32>
    tpu.vector_store %arg7[%c0_5, %c0_6], %6 {strides = array<i32>} : memref<2x128xf32, #tpu.memory_space<vmem>>, vector<2x128xf32>,
    %cst_7 = arith.constant 0.000000e+00 : f32
    %8 = vector.broadcast %cst_7 : f32 to vector<1x1xf32>
    %c0_8 = arith.constant 0 : index
    %c0_9 = arith.constant 0 : index
    %9 = vector.load %arg8[%c0_8, %c0_9] : memref<1x1xf32, #tpu.memory_space<vmem>>, vector<1x1xf32>
    tpu.vector_store %arg8[%c0_8, %c0_9], %8 {strides = array<i32>} : memref<1x1xf32, #tpu.memory_space<vmem>>, vector<1x1xf32>,
    %c0_i32 = arith.constant 0 : i32
    %c2_i32 = arith.constant 2 : i32
    %10 = arith.addi %c0_i32, %c2_i32 : i32
    %c1_i32 = arith.constant 1 : i32
    scf.for %arg9 = %c0_i32 to %10 step %c1_i32  : i32 {
      %c1_i32_25 = arith.constant 1 : i32
      %28 = arith.muli %arg9, %c1_i32_25 : i32
      %c0_i32_26 = arith.constant 0 : i32
      %29 = arith.addi %c0_i32_26, %28 : i32
      %30 = arith.index_cast %29 : i32 to index
      %c0_27 = arith.constant 0 : index
      %c0_28 = arith.constant 0 : index
      %31 = vector.load %arg3[%30, %c0_27, %c0_28] : memref<2x2x128xf32, #tpu.memory_space<vmem>>, vector<1x2x128xf32>
      %32 = vector.shape_cast %31 : vector<1x2x128xf32> to vector<2x128xf32>
      %33 = vector.broadcast %3 : vector<1x128xf32> to vector<2x128xf32>
      %34 = arith.subf %32, %33 : vector<2x128xf32>
      %35 = vector.broadcast %1 : f32 to vector<2x128xf32>
      %36 = arith.mulf %34, %35 : vector<2x128xf32>
      %cst_29 = arith.constant dense<0xFF800000> : vector<2xf32>
      %37 = vector.multi_reduction <maximumf>, %36, %cst_29 [1] : vector<2x128xf32> to vector<2xf32>
      %38 = vector.shape_cast %37 : vector<2xf32> to vector<2x1xf32>
      %39 = vector.broadcast %38 : vector<2x1xf32> to vector<2x128xf32>
      %40 = arith.subf %36, %39 : vector<2x128xf32>
      %41 = math.exp %40 : vector<2x128xf32>
      %cst_30 = arith.constant dense<0.000000e+00> : vector<2xf32>
      %42 = vector.multi_reduction <add>, %41, %cst_30 [1] : vector<2x128xf32> to vector<2xf32>
      %43 = vector.shape_cast %42 : vector<2xf32> to vector<2x1xf32>
      %44 = vector.broadcast %43 : vector<2x1xf32> to vector<2x128xf32>
      %45 = arith.divf %41, %44 : vector<2x128xf32>
      %46 = arith.index_cast %29 : i32 to index
      %c0_31 = arith.constant 0 : index
      %c0_32 = arith.constant 0 : index
      %47 = vector.load %arg2[%46, %c0_31, %c0_32] : memref<4x2x128xf32, #tpu.memory_space<vmem>>, vector<1x2x128xf32>
      %48 = vector.shape_cast %47 : vector<1x2x128xf32> to vector<2x128xf32>
      %49 = vector.broadcast %0 : f32 to vector<2x128xf32>
      %50 = arith.mulf %48, %49 : vector<2x128xf32>
      %cst_33 = arith.constant dense<0xFF800000> : vector<2xf32>
      %51 = vector.multi_reduction <maximumf>, %50, %cst_33 [1] : vector<2x128xf32> to vector<2xf32>
      %52 = vector.shape_cast %51 : vector<2xf32> to vector<2x1xf32>
      %53 = vector.broadcast %52 : vector<2x1xf32> to vector<2x128xf32>
      %54 = arith.subf %50, %53 : vector<2x128xf32>
      %55 = math.exp %54 : vector<2x128xf32>
      %cst_34 = arith.constant dense<0.000000e+00> : vector<2xf32>
      %56 = vector.multi_reduction <add>, %55, %cst_34 [1] : vector<2x128xf32> to vector<2xf32>
      %57 = vector.shape_cast %56 : vector<2xf32> to vector<2x1xf32>
      %58 = math.log %57 : vector<2x1xf32>
      %59 = vector.broadcast %58 : vector<2x1xf32> to vector<2x128xf32>
      %60 = arith.subf %54, %59 : vector<2x128xf32>
      %c0_35 = arith.constant 0 : index
      %c0_36 = arith.constant 0 : index
      %61 = vector.load %arg7[%c0_35, %c0_36] : memref<2x128xf32, #tpu.memory_space<vmem>>, vector<2x128xf32>
      %62 = arith.addf %61, %45 : vector<2x128xf32>
      %c0_37 = arith.constant 0 : index
      %c0_38 = arith.constant 0 : index
      %63 = vector.load %arg7[%c0_37, %c0_38] : memref<2x128xf32, #tpu.memory_space<vmem>>, vector<2x128xf32>
      tpu.vector_store %arg7[%c0_37, %c0_38], %62 {strides = array<i32>} : memref<2x128xf32, #tpu.memory_space<vmem>>, vector<2x128xf32>,
      %c0_39 = arith.constant 0 : index
      %c0_40 = arith.constant 0 : index
      %64 = vector.load %arg6[%c0_39, %c0_40] : memref<2x128xf32, #tpu.memory_space<vmem>>, vector<2x128xf32>
      %65 = arith.addf %64, %60 : vector<2x128xf32>
      %c0_41 = arith.constant 0 : index
      %c0_42 = arith.constant 0 : index
      %66 = vector.load %arg6[%c0_41, %c0_42] : memref<2x128xf32, #tpu.memory_space<vmem>>, vector<2x128xf32>
      tpu.vector_store %arg6[%c0_41, %c0_42], %65 {strides = array<i32>} : memref<2x128xf32, #tpu.memory_space<vmem>>, vector<2x128xf32>,
      %c0_43 = arith.constant 0 : index
      %c0_44 = arith.constant 0 : index
      %67 = vector.load %arg8[%c0_43, %c0_44] : memref<1x1xf32, #tpu.memory_space<vmem>>, vector<1x1xf32>
      %68 = arith.mulf %45, %60 : vector<2x128xf32>
      %69 = vector.shape_cast %68 : vector<2x128xf32> to vector<1x2x128xf32>
      %cst_45 = arith.constant dense<0.000000e+00> : vector<1xf32>
      %70 = vector.multi_reduction <add>, %69, %cst_45 [1, 2] : vector<1x2x128xf32> to vector<1xf32>
      %71 = vector.shape_cast %70 : vector<1xf32> to vector<1x1x1xf32>
      %72 = vector.extract %71[0, 0, 0] : f32 from vector<1x1x1xf32>
      %73 = vector.broadcast %72 : f32 to vector<1x1xf32>
      %74 = arith.addf %67, %73 : vector<1x1xf32>
      %c0_46 = arith.constant 0 : index
      %c0_47 = arith.constant 0 : index
      %75 = vector.load %arg8[%c0_46, %c0_47] : memref<1x1xf32, #tpu.memory_space<vmem>>, vector<1x1xf32>
      tpu.vector_store %arg8[%c0_46, %c0_47], %74 {strides = array<i32>} : memref<1x1xf32, #tpu.memory_space<vmem>>, vector<1x1xf32>,
    }
    %c2_i32_10 = arith.constant 2 : i32
    %c0_i32_11 = arith.constant 0 : i32
    %c2_i32_12 = arith.constant 2 : i32
    %11 = arith.addi %c0_i32_11, %c2_i32_12 : i32
    %c1_i32_13 = arith.constant 1 : i32
    scf.for %arg9 = %c0_i32_11 to %11 step %c1_i32_13  : i32 {
      %c1_i32_25 = arith.constant 1 : i32
      %28 = arith.muli %arg9, %c1_i32_25 : i32
      %c2_i32_26 = arith.constant 2 : i32
      %29 = arith.addi %c2_i32_26, %28 : i32
      %c0_27 = arith.constant 0 : index
      %c0_28 = arith.constant 0 : index
      %30 = vector.load %arg6[%c0_27, %c0_28] : memref<2x128xf32, #tpu.memory_space<vmem>>, vector<2x128xf32>
      %31 = arith.index_cast %29 : i32 to index
      %c0_29 = arith.constant 0 : index
      %c0_30 = arith.constant 0 : index
      %32 = vector.load %arg2[%31, %c0_29, %c0_30] : memref<4x2x128xf32, #tpu.memory_space<vmem>>, vector<1x2x128xf32>
      %33 = vector.shape_cast %32 : vector<1x2x128xf32> to vector<2x128xf32>
      %34 = vector.broadcast %0 : f32 to vector<2x128xf32>
      %35 = arith.mulf %33, %34 : vector<2x128xf32>
      %cst_31 = arith.constant dense<0xFF800000> : vector<2xf32>
      %36 = vector.multi_reduction <maximumf>, %35, %cst_31 [1] : vector<2x128xf32> to vector<2xf32>
      %37 = vector.shape_cast %36 : vector<2xf32> to vector<2x1xf32>
      %38 = vector.broadcast %37 : vector<2x1xf32> to vector<2x128xf32>
      %39 = arith.subf %35, %38 : vector<2x128xf32>
      %40 = math.exp %39 : vector<2x128xf32>
      %cst_32 = arith.constant dense<0.000000e+00> : vector<2xf32>
      %41 = vector.multi_reduction <add>, %40, %cst_32 [1] : vector<2x128xf32> to vector<2xf32>
      %42 = vector.shape_cast %41 : vector<2xf32> to vector<2x1xf32>
      %43 = math.log %42 : vector<2x1xf32>
      %44 = vector.broadcast %43 : vector<2x1xf32> to vector<2x128xf32>
      %45 = arith.subf %39, %44 : vector<2x128xf32>
      %46 = arith.addf %30, %45 : vector<2x128xf32>
      %c0_33 = arith.constant 0 : index
      %c0_34 = arith.constant 0 : index
      %47 = vector.load %arg6[%c0_33, %c0_34] : memref<2x128xf32, #tpu.memory_space<vmem>>, vector<2x128xf32>
      tpu.vector_store %arg6[%c0_33, %c0_34], %46 {strides = array<i32>} : memref<2x128xf32, #tpu.memory_space<vmem>>, vector<2x128xf32>,
    }
    %c2_i32_14 = arith.constant 2 : i32
    %c0_15 = arith.constant 0 : index
    %c0_16 = arith.constant 0 : index
    %12 = vector.load %arg8[%c0_15, %c0_16] : memref<1x1xf32, #tpu.memory_space<vmem>>, vector<1x1xf32>
    %c0_17 = arith.constant 0 : index
    %c0_18 = arith.constant 0 : index
    %13 = vector.load %arg7[%c0_17, %c0_18] : memref<2x128xf32, #tpu.memory_space<vmem>>, vector<2x128xf32>
    %c0_19 = arith.constant 0 : index
    %c0_20 = arith.constant 0 : index
    %14 = vector.load %arg6[%c0_19, %c0_20] : memref<2x128xf32, #tpu.memory_space<vmem>>, vector<2x128xf32>
    %15 = arith.mulf %13, %14 : vector<2x128xf32>
    %16 = vector.shape_cast %15 : vector<2x128xf32> to vector<1x2x128xf32>
    %cst_21 = arith.constant dense<0.000000e+00> : vector<1xf32>
    %17 = vector.multi_reduction <add>, %16, %cst_21 [1, 2] : vector<1x2x128xf32> to vector<1xf32>
    %18 = vector.shape_cast %17 : vector<1xf32> to vector<1x1x1xf32>
    %19 = vector.extract %18[0, 0, 0] : f32 from vector<1x1x1xf32>
    %20 = vector.broadcast %19 : f32 to vector<1x1xf32>
    %21 = arith.subf %12, %20 : vector<1x1xf32>
    %22 = vector.broadcast %2 : f32 to vector<1x1xf32>
    %23 = arith.mulf %21, %22 : vector<1x1xf32>
    %24 = vector.shape_cast %23 : vector<1x1xf32> to vector<1x1x1xf32>
    %25 = vector.shape_cast %24 : vector<1x1x1xf32> to vector<1x1x1xf32>
    %26 = vector.broadcast %25 : vector<1x1x1xf32> to vector<1x8x128xf32>
    %c0_22 = arith.constant 0 : index
    %c0_23 = arith.constant 0 : index
    %c0_24 = arith.constant 0 : index
    %27 = vector.load %arg5[%c0_22, %c0_23, %c0_24] : memref<1x8x128xf32, #tpu.memory_space<vmem>>, vector<1x8x128xf32>
    tpu.vector_store %arg5[%c0_22, %c0_23, %c0_24], %26 {strides = array<i32>} : memref<1x8x128xf32, #tpu.memory_space<vmem>>, vector<1x8x128xf32>,
    return
  }
  func.func @transform_0(%arg0: i32) -> i32 {
    %c0_i32 = arith.constant 0 : i32
    %c0_i32_0 = arith.constant 0 : i32
    return %c0_i32 : i32
  }
  func.func @transform_1(%arg0: i32) -> (i32, i32, i32) {
    %c0_i32 = arith.constant 0 : i32
    %c0_i32_0 = arith.constant 0 : i32
    %c0_i32_1 = arith.constant 0 : i32
    return %c0_i32, %arg0, %c0_i32_0 : i32, i32, i32
  }
  func.func @transform_2(%arg0: i32) -> (i32, i32, i32) {
    %c0_i32 = arith.constant 0 : i32
    %c0_i32_0 = arith.constant 0 : i32
    %c0_i32_1 = arith.constant 0 : i32
    return %c0_i32, %arg0, %c0_i32_0 : i32, i32, i32
  }
  func.func @transform_3(%arg0: i32) -> (i32, i32) {
    %c0_i32 = arith.constant 0 : i32
    %c0_i32_0 = arith.constant 0 : i32
    %c0_i32_1 = arith.constant 0 : i32
    return %c0_i32, %c0_i32_0 : i32, i32
  }
  func.func @transform_4(%arg0: i32) -> (i32, i32, i32) {
    %c0_i32 = arith.constant 0 : i32
    %c0_i32_0 = arith.constant 0 : i32
    %c0_i32_1 = arith.constant 0 : i32
    return %arg0, %c0_i32, %c0_i32_0 : i32, i32, i32
  }
}

</mosaic_0001>

<bundles_post_ra>
// kernel: tpu_custom_call.1
= control target key start
LH: loop header
LB: loop body
LE: loop exit
PB: predicated region body
PF: predicated region fallthrough
CT: control target
= control target key end

     0   :  { %9 = vsyncpa [#allocation8], 0  ;;  %s475_s0 = inlined_call_operand.hbm [shape: f32[4], index: 0, kind: input, shape index: {}]   ;;  %s476_s1 = inlined_call_operand.hbm [shape: f32[4,2,128], index: 1, kind: input, shape index: {}]   ;;  %s477_s2 = inlined_call_operand.hbm [shape: f32[2,2,128], index: 2, kind: input, shape index: {}]   ;;  %s478_s3 = inlined_call_operand.vmem [shape: f32[1,128], index: 3, kind: input, shape index: {}]   ;;  %s479_s4 = inlined_call_operand.hbm [shape: f32[1,8,128], index: 4, kind: output, shape index: {}]  }
   0x1   :  { %10 = vsyncpa [#allocation6], 0 }
   0x2   :  { %11 = vsyncpa [#allocation11], 0 }
   0x3   :  { %12 = vsyncpa [#allocation7], 0  ;;  %s18_s17 = sshll.u32 %s475_s0, 4  ;;  %s26_s20 = sshll.u32 %s476_s1, 4  ;;  %s19_s17 = int_to_ptr.hbm [resolvable:$true] %s18_s17  ;;  %s27_s20 = int_to_ptr.hbm [resolvable:$true] %s26_s20 }
   0x4   :  { %s392_s21 = smov [#allocation5]   ;;  %s393_s22 = smov [#allocation9]  }
   0x5   :  { %21 = dma.hbm_to_smem %s19_s17, 16, %s392_s21, [#allocation8]  }
   0x6   :  { %s28_s23 = sshll.u32 %s393_s22, 4  ;;  %s394_s24 = smov 32   ;;  %s29_s23 = int_to_ptr.vmem [resolvable:$true] %s28_s23 }
   0x7   :  { %s395_s25 = smov 2   ;;  %s39_s28 = sshll.u32 %s477_s2, 4  ;;  %s40_s28 = int_to_ptr.hbm [resolvable:$true] %s39_s28 }
   0x8   :  { %34 = dma.hbm_to_vmem [thread:$0]  %s27_s20, 128, %s29_s23, [#allocation6], %s394_s24, %s394_s24, %s395_s25  }
   0x9   :  { %s396_s0 = smov [#allocation10]  }
   0xa   :  { %s41_s29 = sshll.u32 %s396_s0, 4  ;;  %s42_s29 = int_to_ptr.vmem [resolvable:$true] %s41_s29 }
   0xb   :  { %47 = dma.hbm_to_vmem [thread:$0]  %s40_s28, 64, %s42_s29, [#allocation11], %s394_s24, %s394_s24, %s395_s25  }
   0xc   :  { %376 = dma.done.wait [#allocation8], 16  }
   0xd   :  { %377 = vsyncadd [#allocation8], 4294967280 }
   0xe   :  { %378 = dma.done.wait [#allocation6], 128  }
   0xf   :  { %379 = vsyncadd [#allocation6], 4294967168 }
  0x10   :  { %380 = dma.done.wait [#allocation11], 64  }
  0x11   :  { %381 = vsyncadd [#allocation11], 4294967232 }
  0x12   :  { %62 = sfence }
  0x13   :  { %s434_s1 = sld [smem:[#allocation5]]  ;;  %v439_v0 = vld [vmem:[%s478_s3] sm:$0x1]  ;;  %vm69_vm0 = vcmask 0   ;;  %v397_v1 = vmov 0.0   ;;  %s446_s7 = smov 0  }
  0x14   :  { %s441_s2 = sld [smem:[#allocation5 + $0x1]]  ;;  %67 = vst [vmem:[#allocation2] sm:$0x3] %v397_v1 }
  0x15   :  { %s443_s6 = sld [smem:[#allocation5 + $0x2]]  ;;  %68 = vst [vmem:[#allocation3] sm:$0x3] %v397_v1 }
  0x16   :  { %70 = vst.msk [vmem:[#allocation4] sm:$0x1] %vm69_vm0, %v397_v1 }
  0x17 LB: > { %v81_v2 = vperm.slane %v439_v0, 0  ;;  %s240_s3 = sshll.u32 %s386_s7, 1  ;;  %vm86_vm1 = vcmask 1041408   ;;  %s76_s7 = sadd.s32 1, %s386_s7   ;;  %s386_s7 = sphi %s446_s7, %s76_s7  }
  0x18   : > { %s78_s8 = scalar_lea.vmem [#allocation10], %s240_s3  ;;  %s111_s9 = scalar_lea.vmem [#allocation9], %s240_s3 }
  0x19   : > { %v79_v3 = vld [vmem:[%s78_s8] sm:$0x3]  ;;  %v113_v8 = vstv %s434_s1  ;;  %p73_p0 = scmp.ge.s32.totalorder %s76_s7, 2  }
  0x1a   : > { %v84_v4 = vstv %s441_s2  ;;  %v83_v5 = vsub.f32 %v79_v3, %v81_v2  ;;  %v112_v7 = vld [vmem:[%s111_s9] sm:$0x3]  ;;  %s388_s11 = smov (%p73_p0), 0  }
  0x1b   : > { %v114_v10 = vmul.f32 %v113_v8, %v112_v7  ;;  %v130_v35 = vld [vmem:[#allocation2] sm:$0x3] }
  0x1c   : > { %v85_v6 = vmul.f32 %v84_v4, %v83_v5  ;;  %v127_v37 = vld [vmem:[#allocation3] sm:$0x3] }
  0x1d   : > { %v115_v11 = vsel %vm86_vm1, %v114_v10, -inf  ;;  %v133_v51 = vld [vmem:[#allocation4] sm:$0x1] }
  0x1e   : > { %v87_v9 = vsel %vm86_vm1, %v85_v6, -inf }
  0x1f   : > { %88 = vmax.xlane.f32.xlu0 %v87_v9 }
  0x27   : > { %116 = vmax.xlane.f32.xlu0 %v115_v11 }
  0x92   : > { %v89_v12 = vpop.xlane.xlu0 %88 }
  0x93   : > { %v90_v13 = vsub.f32 %v85_v6, %v89_v12 }
  0x95   : > { %v91_v14 = vmul.f32 1.442695, %v90_v13 }
  0x97   : > { %271 = vpow2.f32 %v91_v14 }
  0x9a   : > { %v117_v15 = vpop.xlane.xlu0 %116 }
  0x9b   : > { %v118_v16 = vsub.f32 %v114_v10, %v117_v15 }
  0x9d   : > { %v272_v17 = vpop.eup %271  ;;  %v119_v18 = vmul.f32 1.442695, %v118_v16 }
  0x9e   : > { %v93_v19 = vsel %vm86_vm1, %v272_v17, 0.0 }
  0x9f   : > { %273 = vpow2.f32 %v119_v18  ;;  %94 = vadd.xlane.f32.xlu1 %v93_v19 }
  0xa5   : > { %v274_v20 = vpop.eup %273 }
  0xa6   : > { %v121_v21 = vsel %vm86_vm1, %v274_v20, 0.0 }
  0xa7   : > { %122 = vadd.xlane.f32.xlu1 %v121_v21 }
 0x112   : > { %v95_v22 = vpop.xlane.xlu1 %94 }
 0x113   : > { %275 = vrcp.f32 %v95_v22  ;;  %v107_v27 = vand.u32 2147483648, %v95_v22  ;;  %v105_v29 = vand.u32 2147483647, %v95_v22  ;;  %vm101_vm3 = vweird.f32 %v95_v22 }
 0x115   : > { %v108_v32 = vor.u32 1.1754944e-38, %v107_v27  ;;  %vm106_vm5 = vcmp.eq.f32.partialorder %v105_v29, 8.507059e+37 }
 0x119   : > { %v276_v23 = vpop.eup %275 }
 0x11a   : > { %v97_v24 = vmul.f32 %v276_v23, %v95_v22  ;;  %v123_v25 = vpop.xlane.xlu1 %122  ;;  %vm102_vm2 = vweird.f32 %v276_v23 }
 0x11b   : > { %277 = vlog2.f32 %v123_v25  ;;  %vm103_vm4 = vmor %vm101_vm3, %vm102_vm2 }
 0x11c   : > { %v98_v26 = vsub.f32 1.0, %v97_v24 }
 0x11e   : > { %v99_v28 = vmul.f32 %v276_v23, %v98_v26 }
 0x120   : > { %v100_v30 = vadd.f32 %v276_v23, %v99_v28 }
 0x121   : > { %v278_v31 = vpop.eup %277 }
 0x122   : > { %v125_v33 = vmul.f32 0.6931472, %v278_v31  ;;  %v104_v34 = vsel %vm103_vm4, %v276_v23, %v100_v30 }
 0x123   : > { %v109_v36 = vsel %vm106_vm5, %v108_v32, %v104_v34 }
 0x124   : > { %v126_v38 = vsub.f32 %v118_v16, %v125_v33  ;;  %v110_v39 = vmul.f32 %v272_v17, %v109_v36 }
 0x126   : > { %v131_v40 = vadd.f32 %v130_v35, %v126_v38  ;;  %v128_v41 = vadd.f32 %v127_v37, %v110_v39  ;;  %v134_v42 = vmul.f32 %v126_v38, %v110_v39 }
 0x128   : > { %132 = vst [vmem:[#allocation2] sm:$0x3] %v131_v40  ;;  %v135_v43 = vsel %vm86_vm1, %v134_v42, 0.0 }
 0x129   : > { %129 = vst [vmem:[#allocation3] sm:$0x3] %v128_v41  ;;  %136 = vadd.xlane.f32.xlu2 %v135_v43 }
 0x19c   : > { %v137_v44 = vpop.xlane.xlu2 %136 }
 0x19d   : > { %v138_v45 = vrot.slane %v137_v44, 4 }
 0x19f   : > { %v139_v46 = vadd.f32 %v138_v45, %v137_v44 }
 0x1a1   : > { %v140_v47 = vrot.slane %v139_v46, 2 }
 0x1a3   : > { %v141_v48 = vadd.f32 %v140_v47, %v139_v46 }
 0x1a5   : > { %v142_v49 = vrot.slane %v141_v48, 1 }
 0x1a7   : > { %v143_v50 = vadd.f32 %v142_v49, %v141_v48 }
 0x1a9   : > { %243 = vpush %v143_v50 }
 0x1da   : > { %s244_s10 = spop %243  ;;  %75 = sbr.rel (!%p73_p0) target bundleno = 23 (0x17), region = 65 }
 0x1db   : > { %v145_v52 = vstv %s244_s10 }
 0x1dc   : > { %v146_v53 = vadd.f32 %v145_v52, %v133_v51 }
 0x1de   : > { %147 = vst.msk [vmem:[#allocation4] sm:$0x1] %vm69_vm0, %v146_v53 }
 0x1df LB: > { %s241_s12 = sshll.u32 %s390_s11, 1  ;;  %v155_v1 = vld [vmem:[#allocation2] sm:$0x3]  ;;  %s153_s11 = sadd.s32 1, %s390_s11   ;;  %s390_s11 = sphi %s388_s11, %s153_s11  }
 0x1e0   : > { %s226_s13 = scalar_lea.vmem [#allocation9], %s241_s12  ;;  %p150_p1 = scmp.ge.s32.totalorder %s153_s11, 2  }
 0x1e1   : > { %v242_v54 = vld [vmem:[%s226_s13 + $0x4] sm:$0x3]  ;;  %v177_v4 = vld [vmem:[#allocation3] sm:$0x3] (%p150_p1)  ;;  %v398_v16 = vmov (%p150_p1), 0   ;;  %s399_s15 = smov (%p150_p1), [#allocation12]  }
 0x1e2   : > { %v160_v55 = vmul.f32 %v242_v54, %v113_v8  ;;  %283 = vset.pattern.permute.xlu0 (%p150_p1), %v398_v16  ;;  %v193_v8 = vstv (%p150_p1), %s443_s6  ;;  %s207_s16 = sshll.u32 (%p150_p1), %s399_s15, 4  ;;  %s209_s19 = sshll.u32 (%p150_p1), %s479_s4, 4  ;;  %s208_s16 = int_to_ptr.vmem [resolvable:$true] %s207_s16  ;;  %s210_s19 = int_to_ptr.hbm [resolvable:$true] %s209_s19 }
 0x1e4   : > { %v162_v56 = vsel %vm86_vm1, %v160_v55, -inf }
 0x1e5   : > { %163 = vmax.xlane.f32.xlu0 %v162_v56  ;;  %v176_v17 = vld [vmem:[#allocation4] sm:$0x1] (%p150_p1) }
 0x258   : > { %v164_v57 = vpop.xlane.xlu0 %163 }
 0x259   : > { %v165_v58 = vsub.f32 %v160_v55, %v164_v57 }
 0x25b   : > { %v166_v59 = vmul.f32 1.442695, %v165_v58 }
 0x25d   : > { %279 = vpow2.f32 %v166_v59 }
 0x263   : > { %v280_v60 = vpop.eup %279 }
 0x264   : > { %v168_v61 = vsel %vm86_vm1, %v280_v60, 0.0 }
 0x265   : > { %169 = vadd.xlane.f32.xlu0 %v168_v61 }
 0x2d8   : > { %v170_v62 = vpop.xlane.xlu0 %169 }
 0x2d9   : > { %281 = vlog2.f32 %v170_v62 }
 0x2df   : > { %v282_v63 = vpop.eup %281 }
 0x2e0   : > { %v172_v0 = vmul.f32 0.6931472, %v282_v63 }
 0x2e2   : > { %v173_v2 = vsub.f32 %v165_v58, %v172_v0  ;;  %152 = sbr.rel (!%p150_p1) target bundleno = 479 (0x1df), region = 76 }
 0x2e4   : > { %v174_v3 = vadd.f32 %v173_v2, %v155_v1 }
 0x2e6   : > { %175 = vst [vmem:[#allocation2] sm:$0x3] %v174_v3 }
 0x2ed   :  { %v178_v5 = vld [vmem:[#allocation2] sm:$0x3] }
 0x2ee   :  { %v179_v6 = vmul.f32 %v178_v5, %v177_v4 }
 0x2f0   :  { %v181_v7 = vsel %vm86_vm1, %v179_v6, 0.0 }
 0x2f1   :  { %182 = vadd.xlane.f32.xlu0 %v181_v7 }
 0x364   :  { %v183_v9 = vpop.xlane.xlu0 %182 }
 0x365   :  { %v184_v10 = vrot.slane %v183_v9, 4 }
 0x367   :  { %v185_v11 = vadd.f32 %v184_v10, %v183_v9 }
 0x369   :  { %v186_v12 = vrot.slane %v185_v11, 2 }
 0x36b   :  { %v187_v13 = vadd.f32 %v186_v12, %v185_v11 }
 0x36d   :  { %v188_v14 = vrot.slane %v187_v13, 1 }
 0x36f   :  { %v189_v15 = vadd.f32 %v188_v14, %v187_v13 }
 0x371   :  { %245 = vpush %v189_v15 }
 0x3a2   :  { %s246_s14 = spop %245 }
 0x3a3   :  { %v191_v18 = vstv %s246_s14 }
 0x3a4   :  { %v192_v19 = vsub.f32 %v176_v17, %v191_v18 }
 0x3a6   :  { %v194_v20 = vmul.f32 %v193_v8, %v192_v19 }
 0x3a8   :  { %v196_v21 = vperm.slane %v194_v20, 0 }
 0x3aa   :  { %198 = vperm.xlu0 %283, %v196_v21  }
 0x41c   :  { %v199_v22 = vpop.permute.xlu0 %198 }
 0x41d   :  { %201 = vst [vmem:[#allocation12] sm:$0xff] %v199_v22 }
 0x41e   :  { %212 = dma.vmem_to_hbm [thread:$0]  %s208_s16, 128, %s210_s19, [#allocation7]  }
 0x41f   :  { %382 = dma.done.wait [#allocation7], 128  }
 0x420   :  { %383 = vsyncadd [#allocation7], 4294967168 }
 0x421   :  { %217 = vsyncpa [#allocation6], 1 }
 0x422   :  { %218 = vsyncpa [#allocation11], 1 }
 0x423   :  { %219 = vsyncpa [#allocation7], 1 }
 0x424   :  { %220 = vsyncpa [#allocation8], 1 }

</bundles_post_ra>
